<compile_context>
chip_gen: v6e
topology: v6e:2x2x1
jax: 0.10.0
libtpu: 0.0.40
codegen_flags: <defaults>
</compile_context>

<pallas_src>
import functools

import jax
import jax.numpy as jnp
import numpy as np
from jax.experimental import pallas as pl
from jax.experimental.pallas import tpu as pltpu


def value_net2_kernel(
    xt_ref,     # [D_in+1, Bt]  f32   x^T; row d_in holds the alert id (as float)
    w1t_ref,    # [H, D_in+1]   wdt   fc1 weight^T with appended zero column
    tt_ref,     # [2H, N_emb]   wdt   (relu(emb) @ w2[H:, :])^T
    w2t_ref,    # [2H, H]       wdt   w2[:H, :]^T
    w34t_ref,   # [O, 2H]       wdt   (w3 @ w4)^T
    bias_ref,   # [2H, 3]       f32   col0[:H]=b1, col1=b2, col2[:O]=b3@w4+b4
    out_ref,    # [O, Bt]       f32   lane-dense output slab
):
    xv = xt_ref[...]                                   # [D_in+1, Bt] f32
    h = w1t_ref.shape[0]
    d_in = w1t_ref.shape[1] - 1
    n_emb = tt_ref.shape[1]
    out_dim = w34t_ref.shape[0]
    bt = xv.shape[1]
    wdt = w1t_ref.dtype

    biases = bias_ref[...]                             # [2H, 3] f32
    b1 = biases[0:h, 0:1]                              # [H, 1]
    b2 = biases[:, 1:2]                                # [2H, 1]
    b34 = biases[0:out_dim, 2:3]                       # [O, 1]

    # fc1: zero alert column in w1t kills the trailing alert row, so use x^T whole.
    h1 = jnp.dot(w1t_ref[...], xv.astype(wdt),
                 preferred_element_type=jnp.float32) + b1        # [H, Bt]
    h1 = jnp.maximum(h1, 0.0)

    # embedding -> relu -> w2 bottom half, pre-folded into T: one-hot matmul.
    alert = xv[d_in:d_in + 1, :].astype(jnp.int32)               # [1, Bt]
    ids = jax.lax.broadcasted_iota(jnp.int32, (n_emb, bt), 0)    # [N_emb, Bt]
    onehot = (ids == alert).astype(wdt)
    e2 = jnp.dot(tt_ref[...], onehot,
                 preferred_element_type=jnp.float32)             # [2H, Bt]

    # fc2 (top half on relu(fc1), bottom half already folded into e2) + relu.
    h2 = jnp.dot(w2t_ref[...], h1.astype(wdt),
                 preferred_element_type=jnp.float32) + e2 + b2   # [2H, Bt]
    h2 = jnp.maximum(h2, 0.0)

    # fc3 . fc4 fused into a single matmul.
    out = jnp.dot(w34t_ref[...], h2.astype(wdt),
                  preferred_element_type=jnp.float32) + b34      # [O, Bt]
    out_ref[...] = out.astype(out_ref.dtype)


def prepare_params(raw_params, compute_dtype=jnp.float32):
    """Offline algebraic fusion; returns fused weights already TRANSPOSED.

    raw_params = (emb, w1, b1, w2, b2, w3, b3, w4, b4) with Linear weights
    stored pre-transposed as [in, out].
    """
    emb, w1, b1, w2, b2, w3, b3, w4, b4 = raw_params
    hp = jax.lax.Precision.HIGHEST
    h = w1.shape[1]
    two_h = w2.shape[1]
    out_dim = w4.shape[1]

    # fc1 weight^T with an extra zero COLUMN (the alert row of x^T hits it).
    w1t = jnp.concatenate([w1.T, jnp.zeros((h, 1), w1.dtype)], axis=1)  # [H, D_in+1]
    # relu(emb) @ w2_bot (embedding + bottom half of fc2 folded); keep transposed.
    tt = jnp.dot(jax.nn.relu(emb), w2[h:, :], precision=hp).T           # [2H, N_emb]
    w2t_top = w2[:h, :].T                                               # [2H, H]
    # fc3 . fc4 fusion (no activation between them).
    w34t = jnp.dot(w3, w4, precision=hp).T                              # [O, 2H]
    b34 = jnp.dot(b3, w4, precision=hp) + b4                            # [1, O]

    biases = jnp.zeros((two_h, 3), jnp.float32)
    biases = biases.at[:h, 0].set(b1[0].astype(jnp.float32))
    biases = biases.at[:, 1].set(b2[0].astype(jnp.float32))
    biases = biases.at[:out_dim, 2].set(b34[0].astype(jnp.float32))

    wdt = compute_dtype
    return (w1t.astype(wdt), tt.astype(wdt), w2t_top.astype(wdt),
            w34t.astype(wdt), biases)


def _pick_block_b(B, block_b):
    if block_b is not None:
        return block_b
    if B <= 1024:
        return B                      # single block; tiny batch, no pipelining gain
    # >=2 grid steps (feeds both v7x TensorCores), tiles capped at 8192 so
    # double-buffered x^T + out stay at ~a few MiB on every generation.
    return min(8192, max(128, (((B + 1) // 2) // 128) * 128))


def _value_net2_call(xt, fused_params, block_b):
    """xt: [input_size, B] f32 (lane-dense). Returns [output_size, B] f32."""
    w1t, tt, w2t, w34t, biases = fused_params
    in_sz, B = xt.shape
    out_dim = w34t.shape[0]

    bt = _pick_block_b(B, block_b)
    grid = (pl.cdiv(B, bt),)
    resident = lambda i: (0, 0)   # weights: same block every step -> stay in VMEM

    return pl.pallas_call(
        value_net2_kernel,
        out_shape=jax.ShapeDtypeStruct((out_dim, B), jnp.float32),
        grid=grid,
        in_specs=[
            pl.BlockSpec((in_sz, bt), lambda i: (0, i)),   # x^T: batch on lanes
            pl.BlockSpec(w1t.shape, resident),
            pl.BlockSpec(tt.shape, resident),
            pl.BlockSpec(w2t.shape, resident),
            pl.BlockSpec(w34t.shape, resident),
            pl.BlockSpec(biases.shape, resident),
        ],
        out_specs=pl.BlockSpec((out_dim, bt), lambda i: (0, i)),
        compiler_params=pltpu.CompilerParams(
            dimension_semantics=("parallel",)),
    )(xt, w1t, tt, w2t, w34t, biases)


@functools.partial(jax.jit, static_argnames=("block_b",))
def value_network2_forward_t(xt, fused_params, block_b=None):
    """Fully lane-dense entry point: xt [input_size, B] -> [output_size, B]."""
    return _value_net2_call(xt.astype(jnp.float32), fused_params, block_b)


@functools.partial(jax.jit, static_argnames=("block_b",))
def value_network2_forward(x, fused_params, block_b=None):
    """Module-compatible entry point: x [B, input_size] -> [B, output_size]."""
    out_t = _value_net2_call(x.T.astype(jnp.float32), fused_params, block_b)
    return out_t.T


def init_params(key, input_size, alert_size, hidden_size, output_size):
    """Deterministic synthetic params mirroring the PyTorch module shapes.
    Linear weights are stored pre-transposed as [in, out]."""
    d_in = input_size - 1
    n_emb = 2 ** alert_size
    h = hidden_size
    ks = jax.random.split(key, 5)

    def lin(k, fan_in, fan_out):
        kw, kb = jax.random.split(k)
        bound = 1.0 / np.sqrt(fan_in)
        w = jax.random.uniform(kw, (fan_in, fan_out), jnp.float32, -bound, bound)
        b = jax.random.uniform(kb, (1, fan_out), jnp.float32, -bound, bound)
        return w, b

    emb = jax.random.normal(ks[0], (n_emb, h), jnp.float32)
    w1, b1 = lin(ks[1], d_in, h)
    w2, b2 = lin(ks[2], 2 * h, 2 * h)
    w3, b3 = lin(ks[3], 2 * h, 2 * h)
    w4, b4 = lin(ks[4], 2 * h, output_size)
    return (emb, w1, b1, w2, b2, w3, b3, w4, b4)


def reference_forward(x, raw_params):
    """Pure-JAX reference matching the PyTorch module semantics."""
    emb, w1, b1, w2, b2, w3, b3, w4, b4 = raw_params
    hp = jax.lax.Precision.HIGHEST
    belief = x[:, :-1]
    alert = x[:, -1].astype(jnp.int32)
    h1 = jnp.dot(belief, w1, precision=hp) + b1
    e = emb[alert]
    out = jax.nn.relu(jnp.concatenate([h1, e], axis=-1))
    out = jax.nn.relu(jnp.dot(out, w2, precision=hp) + b2)
    out = jnp.dot(out, w3, precision=hp) + b3
    out = jnp.dot(out, w4, precision=hp) + b4
    return out


if __name__ == "__main__":
    # Small shapes: input_size=17 (belief dim 16), alert_size=4 (16-row table),
    # hidden_size=32, output_size=8.
    input_size, alert_size, hidden_size, output_size = 17, 4, 32, 8

    key = jax.random.PRNGKey(0)
    kp, kx, ka = jax.random.split(key, 3)
    raw_params = init_params(kp, input_size, alert_size, hidden_size, output_size)
    params_f32 = prepare_params(raw_params, compute_dtype=jnp.float32)

    def make_x(kx_, ka_, batch):
        belief = jax.random.normal(kx_, (batch, input_size - 1), jnp.float32)
        alert = jax.random.randint(
            ka_, (batch, 1), 0, 2 ** alert_size).astype(jnp.float32)
        return jnp.concatenate([belief, alert], axis=-1)

    # Small batch: single block, f32 weights.
    x_small = make_x(kx, ka, 8)
    ref_small = jax.block_until_ready(reference_forward(x_small, raw_params))
    out_small = jax.block_until_ready(value_network2_forward(x_small, params_f32))
    assert out_small.shape == (8, output_size)
    np.testing.assert_allclose(np.asarray(out_small), np.asarray(ref_small),
                               rtol=1e-4, atol=1e-4)

    # Multi-step grid with a ragged last block (exercises pipelining + padding).
    kx2, ka2 = jax.random.split(jax.random.PRNGKey(1))
    x_med = make_x(kx2, ka2, 300)
    ref_med = jax.block_until_ready(reference_forward(x_med, raw_params))
    out_med = jax.block_until_ready(
        value_network2_forward(x_med, params_f32, block_b=128))
    np.testing.assert_allclose(np.asarray(out_med), np.asarray(ref_med),
                               rtol=1e-4, atol=1e-4)

    # Optional bf16 path (halves weight bytes / doubles MXU rate; note this also
    # casts activations to bf16 before each matmul -> documented accuracy hit).
    params_bf16 = prepare_params(raw_params, compute_dtype=jnp.bfloat16)
    out_bf16 = jax.block_until_ready(value_network2_forward(x_small, params_bf16))
    assert out_bf16.shape == (8, output_size)
    np.testing.assert_allclose(np.asarray(out_bf16), np.asarray(ref_small),
                               rtol=1e-1, atol=1e-1)

    print("KERNEL_OK")
</pallas_src>

<mosaic_0001>
module attributes {stable_mosaic.version = 11 : i64} {
  func.func @value_net2_kernel(%arg0: i32, %arg1: memref<17x8xf32, #tpu.memory_space<vmem>>, %arg2: memref<32x17xf32, #tpu.memory_space<vmem>>, %arg3: memref<64x16xf32, #tpu.memory_space<vmem>>, %arg4: memref<64x32xf32, #tpu.memory_space<vmem>>, %arg5: memref<8x64xf32, #tpu.memory_space<vmem>>, %arg6: memref<64x3xf32, #tpu.memory_space<vmem>>, %arg7: memref<8x8xf32, #tpu.memory_space<vmem>>) attributes {dimension_semantics = [#tpu.dimension_semantics<parallel>], iteration_bounds = array<i64: 1>, scalar_prefetch = 0 : i64, scratch_operands = 0 : i64, tpu.core_type = #tpu.core_type<tc>, window_params = [{transform_indices = @transform_0, window_bounds = array<i64: 17, 8>}, {pipeline_mode = #tpu.pipeline_mode<synchronous>, transform_indices = @transform_1, window_bounds = array<i64: 32, 17>}, {pipeline_mode = #tpu.pipeline_mode<synchronous>, transform_indices = @transform_2, window_bounds = array<i64: 64, 16>}, {pipeline_mode = #tpu.pipeline_mode<synchronous>, transform_indices = @transform_3, window_bounds = array<i64: 64, 32>}, {pipeline_mode = #tpu.pipeline_mode<synchronous>, transform_indices = @transform_4, window_bounds = array<i64: 8, 64>}, {pipeline_mode = #tpu.pipeline_mode<synchronous>, transform_indices = @transform_5, window_bounds = array<i64: 64, 3>}, {transform_indices = @transform_6, window_bounds = array<i64: 8, 8>}]} {
    %c0 = arith.constant 0 : index
    %c0_0 = arith.constant 0 : index
    %0 = vector.load %arg1[%c0, %c0_0] : memref<17x8xf32, #tpu.memory_space<vmem>>, vector<17x8xf32>
    %c0_1 = arith.constant 0 : index
    %c0_2 = arith.constant 0 : index
    %1 = vector.load %arg6[%c0_1, %c0_2] : memref<64x3xf32, #tpu.memory_space<vmem>>, vector<64x3xf32>
    %2 = vector.extract_strided_slice %1 {offsets = [0, 0], sizes = [32, 1], strides = [1, 1]} : vector<64x3xf32> to vector<32x1xf32>
    %3 = vector.extract_strided_slice %1 {offsets = [0, 1], sizes = [64, 1], strides = [1, 1]} : vector<64x3xf32> to vector<64x1xf32>
    %4 = vector.extract_strided_slice %1 {offsets = [0, 2], sizes = [8, 1], strides = [1, 1]} : vector<64x3xf32> to vector<8x1xf32>
    %c0_3 = arith.constant 0 : index
    %c0_4 = arith.constant 0 : index
    %5 = vector.load %arg2[%c0_3, %c0_4] : memref<32x17xf32, #tpu.memory_space<vmem>>, vector<32x17xf32>
    %cst = arith.constant dense<0.000000e+00> : vector<32x8xf32>
    %6 = tpu.matmul %5, %0, %cst {dimension_numbers = #tpu.dot_dimension_numbers<[1], [0], [0], [1], [0, 0, 1, 1], [], []>} : vector<32x17xf32>, vector<17x8xf32>, vector<32x8xf32> -> vector<32x8xf32>
    %7 = vector.broadcast %2 : vector<32x1xf32> to vector<32x8xf32>
    %8 = arith.addf %6, %7 : vector<32x8xf32>
    %cst_5 = arith.constant 0.000000e+00 : f32
    %9 = vector.broadcast %cst_5 : f32 to vector<32x8xf32>
    %10 = arith.maximumf %8, %9 : vector<32x8xf32>
    %11 = vector.extract_strided_slice %0 {offsets = [16, 0], sizes = [1, 8], strides = [1, 1]} : vector<17x8xf32> to vector<1x8xf32>
    %12 = arith.fptosi %11 : vector<1x8xf32> to vector<1x8xi32>
    %13 = tpu.iota {dimensions = array<i32: 0>} : vector<16x8xi32>
    %14 = vector.broadcast %12 : vector<1x8xi32> to vector<16x8xi32>
    %15 = arith.cmpi eq, %13, %14 : vector<16x8xi32>
    %16 = arith.extui %15 : vector<16x8xi1> to vector<16x8xi32>
    %17 = arith.sitofp %16 : vector<16x8xi32> to vector<16x8xf32>
    %c0_6 = arith.constant 0 : index
    %c0_7 = arith.constant 0 : index
    %18 = vector.load %arg3[%c0_6, %c0_7] : memref<64x16xf32, #tpu.memory_space<vmem>>, vector<64x16xf32>
    %cst_8 = arith.constant dense<0.000000e+00> : vector<64x8xf32>
    %19 = tpu.matmul %18, %17, %cst_8 {dimension_numbers = #tpu.dot_dimension_numbers<[1], [0], [0], [1], [0, 0, 1, 1], [], []>} : vector<64x16xf32>, vector<16x8xf32>, vector<64x8xf32> -> vector<64x8xf32>
    %c0_9 = arith.constant 0 : index
    %c0_10 = arith.constant 0 : index
    %20 = vector.load %arg4[%c0_9, %c0_10] : memref<64x32xf32, #tpu.memory_space<vmem>>, vector<64x32xf32>
    %cst_11 = arith.constant dense<0.000000e+00> : vector<64x8xf32>
    %21 = tpu.matmul %20, %10, %cst_11 {dimension_numbers = #tpu.dot_dimension_numbers<[1], [0], [0], [1], [0, 0, 1, 1], [], []>} : vector<64x32xf32>, vector<32x8xf32>, vector<64x8xf32> -> vector<64x8xf32>
    %22 = arith.addf %21, %19 : vector<64x8xf32>
    %23 = vector.broadcast %3 : vector<64x1xf32> to vector<64x8xf32>
    %24 = arith.addf %22, %23 : vector<64x8xf32>
    %cst_12 = arith.constant 0.000000e+00 : f32
    %25 = vector.broadcast %cst_12 : f32 to vector<64x8xf32>
    %26 = arith.maximumf %24, %25 : vector<64x8xf32>
    %c0_13 = arith.constant 0 : index
    %c0_14 = arith.constant 0 : index
    %27 = vector.load %arg5[%c0_13, %c0_14] : memref<8x64xf32, #tpu.memory_space<vmem>>, vector<8x64xf32>
    %cst_15 = arith.constant dense<0.000000e+00> : vector<8x8xf32>
    %28 = tpu.matmul %27, %26, %cst_15 {dimension_numbers = #tpu.dot_dimension_numbers<[1], [0], [0], [1], [0, 0, 1, 1], [], []>} : vector<8x64xf32>, vector<64x8xf32>, vector<8x8xf32> -> vector<8x8xf32>
    %29 = vector.broadcast %4 : vector<8x1xf32> to vector<8x8xf32>
    %30 = arith.addf %28, %29 : vector<8x8xf32>
    %c0_16 = arith.constant 0 : index
    %c0_17 = arith.constant 0 : index
    %31 = vector.load %arg7[%c0_16, %c0_17] : memref<8x8xf32, #tpu.memory_space<vmem>>, vector<8x8xf32>
    tpu.vector_store %arg7[%c0_16, %c0_17], %30 {strides = array<i32>} : memref<8x8xf32, #tpu.memory_space<vmem>>, vector<8x8xf32>,
    return
  }
  func.func @transform_0(%arg0: i32) -> (i32, i32) {
    %c0_i32 = arith.constant 0 : i32
    %c0_i32_0 = arith.constant 0 : i32
    return %c0_i32, %arg0 : i32, i32
  }
  func.func @transform_1(%arg0: i32) -> (i32, i32) {
    %c0_i32 = arith.constant 0 : i32
    %c0_i32_0 = arith.constant 0 : i32
    %c0_i32_1 = arith.constant 0 : i32
    return %c0_i32, %c0_i32_0 : i32, i32
  }
  func.func @transform_2(%arg0: i32) -> (i32, i32) {
    %c0_i32 = arith.constant 0 : i32
    %c0_i32_0 = arith.constant 0 : i32
    %c0_i32_1 = arith.constant 0 : i32
    return %c0_i32, %c0_i32_0 : i32, i32
  }
  func.func @transform_3(%arg0: i32) -> (i32, i32) {
    %c0_i32 = arith.constant 0 : i32
    %c0_i32_0 = arith.constant 0 : i32
    %c0_i32_1 = arith.constant 0 : i32
    return %c0_i32, %c0_i32_0 : i32, i32
  }
  func.func @transform_4(%arg0: i32) -> (i32, i32) {
    %c0_i32 = arith.constant 0 : i32
    %c0_i32_0 = arith.constant 0 : i32
    %c0_i32_1 = arith.constant 0 : i32
    return %c0_i32, %c0_i32_0 : i32, i32
  }
  func.func @transform_5(%arg0: i32) -> (i32, i32) {
    %c0_i32 = arith.constant 0 : i32
    %c0_i32_0 = arith.constant 0 : i32
    %c0_i32_1 = arith.constant 0 : i32
    return %c0_i32, %c0_i32_0 : i32, i32
  }
  func.func @transform_6(%arg0: i32) -> (i32, i32) {
    %c0_i32 = arith.constant 0 : i32
    %c0_i32_0 = arith.constant 0 : i32
    return %c0_i32, %arg0 : i32, i32
  }
}

</mosaic_0001>

<bundles_post_ra>
// kernel: value_network2_forward.1
= control target key start
LH: loop header
LB: loop body
LE: loop exit
PB: predicated region body
PF: predicated region fallthrough
CT: control target
= control target key end

     0   :  { %vm71_vm0 = vcmask 1040384   ;;  %vm58_vm1 = vcmask 138240   ;;  %v736_v2 = vmov 0   ;;  %v165_v13 = vlaneseq  ;;  %s918_s0 = inlined_call_operand.vmem [shape: f32[17,8], index: 0, kind: input, shape index: {}]   ;;  %s919_s1 = inlined_call_operand.vmem [shape: f32[32,17], index: 1, kind: input, shape index: {}]   ;;  %s920_s5 = inlined_call_operand.vmem [shape: f32[64,3], index: 5, kind: input, shape index: {}]   ;;  %s921_s2 = inlined_call_operand.vmem [shape: f32[64,16], index: 2, kind: input, shape index: {}]   ;;  %s922_s3 = inlined_call_operand.vmem [shape: f32[64,32], index: 3, kind: input, shape index: {}]   ;;  %s923_s4 = inlined_call_operand.vmem [shape: f32[8,64], index: 4, kind: input, shape index: {}]   ;;  %s924_s6 = inlined_call_operand.vmem [shape: f32[8,8], index: 6, kind: output, shape index: {}]  }
   0x1   :  { %v25_v0 = vld [vmem:[%s918_s0 + $0x10] sm:$0x1]  ;;  %v24_v1 = vld [vmem:[%s918_s0 + $0x8] sm:$0xff]  ;;  %731 = vset.pattern.permute.xlu1 %v736_v2  ;;  %730 = vset.pattern.permute.xlu0 %v736_v2  ;;  %v34_v3 = vld [vmem:[%s919_s1] sm:$0xff]  ;;  %v737_v19 = vmov 1.0   ;;  %vm186_vm4 = vcmask 130048  }
   0x2   :  { %655 = vmatprep.subr.msk.mxu0 %vm71_vm0, %v25_v0  ;;  %v23_v4 = vld [vmem:[%s918_s0] sm:$0xff]  ;;  %661 = vmatprep.mubr.msk.f32.mxu0 %vm58_vm1, %v34_v3  ;;  %v793_v5 = vld [vmem:[%s920_s5 + $0x18] sm:$0xff]  ;;  %v798_v6 = vld [vmem:[%s920_s5 + $0x8] sm:$0xff]  ;;  %v722_v12 = vtrunc.f32 %v25_v0  ;;  %v166_v14 = vshrl.u32 %v165_v13, 7  ;;  %vm324_vm5 = vcmask 261120   ;;  %v738_v31 = vmov 1  }
   0x3   :  { %656 = vmatpush3.msk.msra.mxu0 %vm71_vm0, %v25_v0  ;;  %55 = vperm.xlu0 %730, %v793_v5   ;;  %v35_v7 = vld [vmem:[%s919_s1 + $0x8] sm:$0xff]  ;;  %v28_v8 = vld [vmem:[%s920_s5 + $0x10] sm:$0xff]  ;;  %v814_v10 = vld [vmem:[%s920_s5] sm:$0xff]  ;;  %v739_v57 = vmov 0.0   ;;  %vm740_vm6 = vmmov 0   ;;  %v741_v58 = vmov 2  }
   0x4   :  { %657 = vmatprep.subr.mxu0 %v24_v1  ;;  %45 = vperm.xlu1 %731, %v798_v6   ;;  %v36_v9 = vld [vmem:[%s919_s1 + $0x10] sm:$0xff]  ;;  %v37_v11 = vld [vmem:[%s919_s1 + $0x18] sm:$0xff]  ;;  %v723_v15 = vcvt.f32.s32 %v722_v12  ;;  %v170_v16 = vsub.s32 0, %v166_v14  ;;  %v167_v17 = vadd.s32 8, %v166_v14  ;;  %v178_v20 = vld [vmem:[%s921_s2] sm:$0xff]  ;;  %vm511_vm7 = vcmask 523264  }
   0x5   :  { %658 = vmatpush3.msra.mxu0 %v24_v1  ;;  %671 = vmatprep.mubr.msk.f32.mxu1 %vm186_vm4, %v178_v20  ;;  %v179_v21 = vld [vmem:[%s921_s2 + $0x8] sm:$0xff]  ;;  %v316_v22 = vld [vmem:[%s922_s3] sm:$0xff]  ;;  %v180_v23 = vld [vmem:[%s921_s2 + $0x10] sm:$0xff]  ;;  %vm585_vm8 = vcmask 64512  }
   0x6   :  { %659 = vmatprep.subr.mxu0 %v23_v4  ;;  %v171_v18 = vrot.slane %v723_v15, %v170_v16  ;;  %v181_v24 = vld [vmem:[%s921_s2 + $0x18] sm:$0xff]  ;;  %v182_v25 = vld [vmem:[%s921_s2 + $0x20] sm:$0xff]  ;;  %v183_v26 = vld [vmem:[%s921_s2 + $0x28] sm:$0xff] }
   0x7   :  { %660 = vmatpush3.msra.mxu0 %v23_v4  ;;  %50 = vperm.xlu0 %730, %v28_v8   ;;  %v184_v27 = vld [vmem:[%s921_s2 + $0x30] sm:$0xff]  ;;  %v185_v28 = vld [vmem:[%s921_s2 + $0x38] sm:$0xff]  ;;  %v31_v32 = vld [vmem:[%s920_s5 + $0x28] sm:$0xff] }
   0x8   :  { %662 = vmatmul.mubr.msk.f32.vlgmr.msra.gmra.mxu0 %vm58_vm1, %v35_v7  ;;  %40 = vperm.xlu1 %731, %v814_v10   ;;  %vm173_vm2 = vcmp.eq.s32.totalorder %v167_v17, %v171_v18  ;;  %vm172_vm3 = vcmp.eq.s32.totalorder %v166_v14, %v171_v18  ;;  %v32_v29 = vld [vmem:[%s920_s5 + $0x30] sm:$0xff]  ;;  %v33_v30 = vld [vmem:[%s920_s5 + $0x38] sm:$0xff]  ;;  %v30_v33 = vld [vmem:[%s920_s5 + $0x20] sm:$0xff] }
   0x9   :  { %664 = vmatprep.mubr.msk.f32.mxu0 %vm58_vm1, %v36_v9  ;;  %667 = vmatprep.subr.msk.mxu1 %vm173_vm2, %v737_v19  ;;  %v317_v50 = vld [vmem:[%s922_s3 + $0x8] sm:$0xff]  ;;  %v318_v51 = vld [vmem:[%s922_s3 + $0x10] sm:$0xff]  ;;  %v319_v52 = vld [vmem:[%s922_s3 + $0x18] sm:$0xff] }
   0xa   :  { %668 = vmatpush3.msk.msra.mxu1 %vm173_vm2, %v737_v19  ;;  %v320_v53 = vld [vmem:[%s922_s3 + $0x20] sm:$0xff]  ;;  %v321_v54 = vld [vmem:[%s922_s3 + $0x28] sm:$0xff]  ;;  %v322_v55 = vld [vmem:[%s922_s3 + $0x30] sm:$0xff] }
   0xb   :  { %669 = vmatprep.subr.msk.mxu1 %vm172_vm3, %v737_v19  ;;  %732 = vset.pattern.permute.xlu0 %v738_v31  ;;  %v323_v56 = vld [vmem:[%s922_s3 + $0x38] sm:$0xff] }
   0xc   :  { %665 = vmatmul.mubr.msk.f32.gmra.mxu0 %vm58_vm1, %v37_v11  ;;  %670 = vmatpush3.msk.msra.mxu1 %vm172_vm3, %v737_v19 }
   0xd   :  { %672 = vmatmul.mubr.msk.f32.vlgmr.msra.gmra.mxu1 %vm186_vm4, %v179_v21  ;;  %691 = vmatprep.mubr.msk.f32.mxu0 %vm324_vm5, %v316_v22 }
   0xe   :  { %674 = vmatprep.mubr.msk.f32.mxu1 %vm186_vm4, %v180_v23  ;;  %733 = vset.pattern.permute.xlu1 %v738_v31 }
   0xf   :  { %482 = vperm.xlu1 %733, %v32_v29   ;;  %487 = vperm.xlu0 %732, %v33_v30  }
  0x10   :  { %703 = vmatprep.subr.mxu1 %v739_v57 }
  0x11   :  { %675 = vmatmul.mubr.msk.f32.gmra.mxu1 %vm186_vm4, %v181_v24 }
  0x12   :  { %677 = vmatprep.mubr.msk.f32.mxu1 %vm186_vm4, %v182_v25 }
  0x13   :  { %477 = vperm.xlu1 %733, %v31_v32   ;;  %472 = vperm.xlu0 %732, %v30_v33  }
  0x15   :  { %678 = vmatmul.mubr.msk.f32.gmra.mxu1 %vm186_vm4, %v183_v26 }
  0x16   :  { %680 = vmatprep.mubr.msk.f32.mxu1 %vm186_vm4, %v184_v27 }
  0x17   :  { %467 = vperm.xlu1 %733, %v793_v5   ;;  %463 = vperm.xlu0 %732, %v28_v8  }
  0x19   :  { %681 = vmatmul.mubr.msk.f32.gmra.mxu1 %vm186_vm4, %v185_v28 }
  0x1a   :  { %719 = vmatprep.mubr.msk.f32.mxu1 %vm740_vm6, %v739_v57 }
  0x1b   :  { %459 = vperm.xlu1 %733, %v798_v6   ;;  %455 = vperm.xlu0 %732, %v814_v10  }
  0x1f   :  { %734 = vset.pattern.permute.xlu1 %v741_v58  ;;  %735 = vset.pattern.permute.xlu0 %v741_v58 }
  0x20   :  { %508 = vperm.xlu1 %734, %v814_v10  }
  0x7e   :  { %v56_v34 = vpop.permute.xlu0 %55 }
  0x7f   :  { %v46_v35 = vpop.permute.xlu1 %45 }
  0x82   :  { %v51_v39 = vpop.permute.xlu0 %50 }
  0x83   :  { %v41_v41 = vpop.permute.xlu1 %40 }
  0x8a   :  { %v483_v2 = vpop.permute.xlu1 %482  ;;  %v488_v4 = vpop.permute.xlu0 %487 }
  0x8e   :  { %v478_v8 = vpop.permute.xlu1 %477  ;;  %v473_v12 = vpop.permute.xlu0 %472 }
  0x92   :  { %v468_v20 = vpop.permute.xlu1 %467  ;;  %v464_v25 = vpop.permute.xlu0 %463 }
  0x96   :  { %v460_v32 = vpop.permute.xlu1 %459 }
  0xc8   :  { %v663_v36 = vpop.f32.mrf.mxu0 }
  0xc9   :  { %v147_v43 = vadd.f32 %v663_v36, %v46_v35  ;;  %v456_v36 = vpop.permute.xlu0 %455 }
  0xca   :  { %v141_v37 = vpop.f32.mrf.mxu0 }
  0xcb   :  { %v142_v46 = vadd.f32 %v141_v37, %v41_v41  ;;  %v161_v48 = vmax.f32 %v147_v43, 0.0  ;;  %v506_v43 = vld [vmem:[%s923_s4] sm:$0xff] }
  0xcc   :  { %v666_v38 = vpop.f32.mrf.mxu0 }
  0xcd   :  { %v157_v40 = vadd.f32 %v666_v38, %v56_v34  ;;  %v160_v49 = vmax.f32 %v142_v46, 0.0  ;;  %v673_v59 = vpop.f32.mrf.mxu1 }
  0xce   :  { %v151_v42 = vpop.f32.mrf.mxu0 }
  0xcf   :  { %v163_v44 = vmax.f32 %v157_v40, 0.0  ;;  %v152_v45 = vadd.f32 %v151_v42, %v51_v39  ;;  %v277_v60 = vpop.f32.mrf.mxu1 }
  0xd1   :  { %v162_v47 = vmax.f32 %v152_v45, 0.0  ;;  %683 = vmatprep.subr.mxu0 %v163_v44  ;;  %v676_v61 = vpop.f32.mrf.mxu1 }
  0xd2   :  { %684 = vmatpush3.msra.mxu0 %v163_v44  ;;  %v509_v44 = vpop.permute.xlu1 %508 }
  0xd3   :  { %685 = vmatprep.subr.mxu0 %v162_v47  ;;  %v287_v62 = vpop.f32.mrf.mxu1 }
  0xd4   :  { %686 = vmatpush3.msra.mxu0 %v162_v47 }
  0xd5   :  { %687 = vmatprep.subr.mxu0 %v161_v48  ;;  %v679_v1 = vpop.f32.mrf.mxu1 }
  0xd6   :  { %688 = vmatpush3.msra.mxu0 %v161_v48 }
  0xd7   :  { %689 = vmatprep.subr.mxu0 %v160_v49  ;;  %v297_v6 = vpop.f32.mrf.mxu1 }
  0xd8   :  { %690 = vmatpush3.msra.mxu0 %v160_v49 }
  0xd9   :  { %692 = vmatmul.mubr.msk.f32.vlgmr.msra.gmra.mxu0 %vm324_vm5, %v317_v50  ;;  %v682_v9 = vpop.f32.mrf.mxu1 }
  0xda   :  { %694 = vmatprep.mubr.msk.f32.mxu0 %vm324_vm5, %v318_v51 }
  0xdb   :  { %v307_v15 = vpop.f32.mrf.mxu1 }
  0xdd   :  { %695 = vmatmul.mubr.msk.f32.gmra.mxu0 %vm324_vm5, %v319_v52 }
  0xde   :  { %697 = vmatprep.mubr.msk.f32.mxu0 %vm324_vm5, %v320_v53 }
  0xe1   :  { %698 = vmatmul.mubr.msk.f32.gmra.mxu0 %vm324_vm5, %v321_v54 }
  0xe2   :  { %700 = vmatprep.mubr.msk.f32.mxu0 %vm324_vm5, %v322_v55 }
  0xe5   :  { %701 = vmatmul.mubr.msk.f32.gmra.mxu0 %vm324_vm5, %v323_v56 }
 0x199   :  { %v693_v63 = vpop.f32.mrf.mxu0 }
 0x19a   :  { %v421_v29 = vadd.f32 %v693_v63, %v673_v59 }
 0x19b   :  { %v415_v0 = vpop.f32.mrf.mxu0 }
 0x19c   :  { %v416_v33 = vadd.f32 %v415_v0, %v277_v60  ;;  %v491_v37 = vadd.f32 %v460_v32, %v421_v29 }
 0x19d   :  { %v696_v3 = vpop.f32.mrf.mxu0 }
 0x19e   :  { %v431_v21 = vadd.f32 %v696_v3, %v676_v61  ;;  %v490_v39 = vadd.f32 %v456_v36, %v416_v33  ;;  %v499_v41 = vmax.f32 %v491_v37, 0.0 }
 0x19f   :  { %v425_v5 = vpop.f32.mrf.mxu0 }
 0x1a0   :  { %v426_v26 = vadd.f32 %v425_v5, %v287_v62  ;;  %v493_v30 = vadd.f32 %v468_v20, %v431_v21  ;;  %v498_v42 = vmax.f32 %v490_v39, 0.0 }
 0x1a1   :  { %v699_v7 = vpop.f32.mrf.mxu0 }
 0x1a2   :  { %v441_v14 = vadd.f32 %v699_v7, %v679_v1  ;;  %v492_v34 = vadd.f32 %v464_v25, %v426_v26  ;;  %v501_v38 = vmax.f32 %v493_v30, 0.0 }
 0x1a3   :  { %v435_v11 = vpop.f32.mrf.mxu0 }
 0x1a4   :  { %v436_v17 = vadd.f32 %v435_v11, %v297_v6  ;;  %v495_v22 = vadd.f32 %v478_v8, %v441_v14  ;;  %v500_v40 = vmax.f32 %v492_v34, 0.0 }
 0x1a5   :  { %v702_v13 = vpop.f32.mrf.mxu0 }
 0x1a6   :  { %v451_v10 = vadd.f32 %v702_v13, %v682_v9  ;;  %v494_v27 = vadd.f32 %v473_v12, %v436_v17  ;;  %v503_v31 = vmax.f32 %v495_v22, 0.0 }
 0x1a7   :  { %v445_v16 = vpop.f32.mrf.mxu0 }
 0x1a8   :  { %v497_v18 = vadd.f32 %v488_v4, %v451_v10  ;;  %v446_v19 = vadd.f32 %v445_v16, %v307_v15  ;;  %v502_v35 = vmax.f32 %v494_v27, 0.0 }
 0x1aa   :  { %v505_v23 = vmax.f32 %v497_v18, 0.0  ;;  %v496_v24 = vadd.f32 %v483_v2, %v446_v19 }
 0x1ac   :  { %v504_v28 = vmax.f32 %v496_v24, 0.0  ;;  %704 = vmatpush3.msra.mxu1 %v505_v23 }
 0x1ad   :  { %705 = vmatprep.subr.mxu1 %v739_v57 }
 0x1ae   :  { %706 = vmatpush3.msra.mxu1 %v504_v28 }
 0x1af   :  { %707 = vmatprep.subr.mxu1 %v739_v57 }
 0x1b0   :  { %708 = vmatpush3.msra.mxu1 %v503_v31 }
 0x1b1   :  { %709 = vmatprep.subr.mxu1 %v739_v57 }
 0x1b2   :  { %710 = vmatpush3.msra.mxu1 %v502_v35 }
 0x1b3   :  { %711 = vmatprep.subr.mxu1 %v739_v57 }
 0x1b4   :  { %712 = vmatpush3.msra.mxu1 %v501_v38 }
 0x1b5   :  { %713 = vmatprep.subr.mxu1 %v739_v57 }
 0x1b6   :  { %714 = vmatpush3.msra.mxu1 %v500_v40 }
 0x1b7   :  { %715 = vmatprep.subr.mxu1 %v739_v57 }
 0x1b8   :  { %716 = vmatpush3.msra.mxu1 %v499_v41 }
 0x1b9   :  { %717 = vmatprep.subr.mxu1 %v739_v57 }
 0x1ba   :  { %718 = vmatpush3.msra.mxu1 %v498_v42 }
 0x1bb   :  { %720 = vmatmul.mubr.msk.f32.vlgmr.msra.gmra.mxu1 %vm511_vm7, %v506_v43 }
 0x27b   :  { %v581_v45 = vpop.f32.mrf.mxu1 }
 0x27c   :  { %v582_v46 = vadd.f32 %v581_v45, %v509_v44 }
 0x27d   :  { %v721_v47 = vpop.f32.mrf.mxu1 }
 0x27e   :  { %586 = vst.msk [vmem:[%s924_s6] sm:$0xff] %vm585_vm8, %v582_v46 }

</bundles_post_ra>
